<compile_context>
chip_gen: v6e
topology: v6e:2x2x1
jax: 0.10.0
libtpu: 0.0.40
codegen_flags: <defaults>
</compile_context>

<pallas_src>
import functools

import jax
import jax.numpy as jnp
from jax.experimental import pallas as pl
from jax.experimental.pallas import tpu as pltpu

LANE = 128
SUBLANE_BF16 = 16   # bf16 packs 16 sublanes per vreg


def _round_up(x, m):
    return ((x + m - 1) // m) * m


def dqn_mlp_kernel(x_ref,
                   w1_ref, b1_ref,
                   w2_ref, b2_ref,
                   w3_ref, b3_ref,
                   w4_ref, b4_ref,
                   o_ref):
    """Fused 4-layer MLP forward for one batch tile.

    Every jnp.dot is bf16(LHS) x bf16(weights) with f32 accumulation
    (native bf16 MXU path).  Bias-add + ReLU run on the VPU in f32.
    Output tile is (TB, 128) -> lane-dense store.
    """
    h = jnp.dot(x_ref[...].astype(jnp.bfloat16), w1_ref[...],
                preferred_element_type=jnp.float32)
    h = jnp.maximum(h + b1_ref[...], 0.0)          # ReLU; Dropout -> identity (eval)

    h = jnp.dot(h.astype(jnp.bfloat16), w2_ref[...],
                preferred_element_type=jnp.float32)
    h = jnp.maximum(h + b2_ref[...], 0.0)

    h = jnp.dot(h.astype(jnp.bfloat16), w3_ref[...],
                preferred_element_type=jnp.float32)
    h = jnp.maximum(h + b3_ref[...], 0.0)

    out = jnp.dot(h.astype(jnp.bfloat16), w4_ref[...],
                  preferred_element_type=jnp.float32) + b4_ref[...]
    o_ref[...] = out.astype(o_ref.dtype)


def prepare_params(params, action_size):
    """One-time weight preparation (hoisted out of the per-call wrapper).

    - final layer zero-padded to a full 128-lane width (lane-dense output stores)
    - weights cast to bf16 (f32 accumulation happens in-kernel)
    - biases normalized to f32
    Returns a flat tuple (w1,b1,w2,b2,w3,b3,w4,b4).
    """
    A_pad = _round_up(max(action_size, LANE), LANE)
    w4, b4 = params[-1]
    w4p = jnp.zeros((w4.shape[0], A_pad), w4.dtype).at[:, :action_size].set(w4)
    b4p = jnp.zeros((1, A_pad), b4.dtype).at[:, :action_size].set(b4)
    layer_params = list(params[:-1]) + [(w4p, b4p)]

    flat = []
    for w, b in layer_params:
        flat.append(jnp.asarray(w, jnp.bfloat16))
        flat.append(jnp.asarray(b, jnp.float32))
    return tuple(flat)


@functools.partial(jax.jit, static_argnames=("action_size", "block_b"))
def dqn_forward(state, flat_params, action_size, block_b=1024):
    """Forward pass through the fused Pallas kernel.

    state:       (B, state_size) f32
    flat_params: output of prepare_params()
    """
    B, S = state.shape
    A_pad = flat_params[-1].shape[1]

    # --- batch tiling ---------------------------------------------------
    # Target ~2 tiles so the parallel batch axis can use both v7x TCs; cap at
    # block_b so very large batches still tile.  TB multiple of 16 (bf16).
    TB_target = _round_up(max(1, (B + 1) // 2), SUBLANE_BF16)
    TB = min(block_b, TB_target)
    B_pad = _round_up(B, TB)
    if B_pad != B:
        state = jnp.pad(state, ((0, B_pad - B), (0, 0)))
    grid_b = B_pad // TB

    # x/out tiles walk the batch; weights/biases are grid-invariant so they
    # stay VMEM-resident across all grid steps (loaded once).
    x_spec = pl.BlockSpec((TB, S), lambda i: (i, 0))
    out_spec = pl.BlockSpec((TB, A_pad), lambda i: (i, 0))
    param_specs = [pl.BlockSpec(p.shape, lambda i: (0, 0)) for p in flat_params]

    weights = flat_params[0::2]
    flops = 2 * B_pad * sum(w.shape[0] * w.shape[1] for w in weights)
    bytes_accessed = (sum(int(p.size) * p.dtype.itemsize for p in flat_params)
                      + B_pad * S * 4 + B_pad * A_pad * 4)

    out = pl.pallas_call(
        dqn_mlp_kernel,
        out_shape=jax.ShapeDtypeStruct((B_pad, A_pad), jnp.float32),
        grid_spec=pltpu.PrefetchScalarGridSpec(
            num_scalar_prefetch=0,
            grid=(grid_b,),
            in_specs=[x_spec, *param_specs],
            out_specs=out_spec,
        ),
        compiler_params=pltpu.CompilerParams(
            dimension_semantics=("parallel",),      # shard batch over v7x's 2 TCs
            vmem_limit_bytes=32 * 1024 * 1024,      # fits v5e/v6e/v7x at TB<=1024
        ),
        cost_estimate=pl.CostEstimate(
            flops=flops, transcendentals=0, bytes_accessed=bytes_accessed),
    )(state, *flat_params)

    return out[:B, :action_size]


# ---------------------------------------------------------------------------
# Parameter init (matches PyTorch _init_weights) and pure-JAX references.
# ---------------------------------------------------------------------------

def xavier_uniform(key, fan_in, fan_out, dtype=jnp.float32):
    """Matches torch.nn.init.xavier_uniform_ (gain=1)."""
    limit = jnp.sqrt(6.0 / (fan_in + fan_out))
    return jax.random.uniform(key, (fan_in, fan_out), dtype=dtype,
                              minval=-limit, maxval=limit)


def init_dqn_params(key, state_size, action_size, hidden_sizes=(512, 256, 128)):
    sizes = [state_size, *hidden_sizes, action_size]
    params = []
    for i in range(len(sizes) - 1):
        key, sub = jax.random.split(key)
        w = xavier_uniform(sub, sizes[i], sizes[i + 1])
        b = jnp.zeros((1, sizes[i + 1]), jnp.float32)    # constant_(bias, 0)
        params.append((w, b))
    return params


def reference_forward_bf16(state, params):
    """Reference matching what the kernel computes: weights AND per-layer
    matmul inputs rounded to bf16, f32 accumulation.  Isolates kernel bugs."""
    h = state
    n = len(params)
    for i, (w, b) in enumerate(params):
        w_r = w.astype(jnp.bfloat16).astype(jnp.float32)
        h_r = h.astype(jnp.bfloat16).astype(jnp.float32)
        h = jnp.dot(h_r, w_r, precision=jax.lax.Precision.HIGHEST) + b
        if i < n - 1:
            h = jnp.maximum(h, 0.0)
    return h


def reference_forward_f32(state, params):
    """Unquantized f32 reference (true PyTorch eval-mode forward) — bounds the
    bf16 weight/activation quantization drift."""
    h = state
    n = len(params)
    for i, (w, b) in enumerate(params):
        h = jnp.dot(h, w, precision=jax.lax.Precision.HIGHEST) + b
        if i < n - 1:
            h = jnp.maximum(h, 0.0)
    return h


if __name__ == "__main__":
    # Module-consistent small shapes: state_size=32, action_size=8,
    # default hidden_sizes [512, 256, 128].
    state_size = 32
    action_size = 8
    hidden_sizes = (512, 256, 128)

    key = jax.random.PRNGKey(0)
    key, pkey, xkey1, xkey2 = jax.random.split(key, 4)
    params = init_dqn_params(pkey, state_size, action_size, hidden_sizes)
    flat_params = prepare_params(params, action_size)     # hoisted, done once

    # Test 1: tiny batch (single grid step).
    b1 = 8
    s1 = jax.random.normal(xkey1, (b1, state_size), jnp.float32)
    out1 = jax.block_until_ready(dqn_forward(s1, flat_params, action_size))
    ref1 = reference_forward_bf16(s1, params)
    ref1_f32 = reference_forward_f32(s1, params)
    assert out1.shape == (b1, action_size)
    assert jnp.allclose(out1, ref1, atol=1e-3, rtol=1e-3), "mismatch vs bf16 ref (B=8)"
    assert jnp.allclose(out1, ref1_f32, atol=1e-1, rtol=1e-1), "bf16 drift vs f32 ref (B=8)"

    # Test 2: non-multiple batch with a small block -> multi-step grid + padding path.
    b2 = 50
    s2 = jax.random.normal(xkey2, (b2, state_size), jnp.float32)
    out2 = jax.block_until_ready(dqn_forward(s2, flat_params, action_size, block_b=16))
    ref2 = reference_forward_bf16(s2, params)
    ref2_f32 = reference_forward_f32(s2, params)
    assert out2.shape == (b2, action_size)
    assert jnp.allclose(out2, ref2, atol=1e-3, rtol=1e-3), "mismatch vs bf16 ref (B=50)"
    assert jnp.allclose(out2, ref2_f32, atol=1e-1, rtol=1e-1), "bf16 drift vs f32 ref (B=50)"

    print("KERNEL_OK")
</pallas_src>

<mosaic_0001>
module attributes {stable_mosaic.version = 11 : i64} {
  func.func @dqn_mlp_kernel(%arg0: i32, %arg1: memref<16x32xf32, #tpu.memory_space<vmem>>, %arg2: memref<32x512xbf16, #tpu.memory_space<vmem>>, %arg3: memref<1x512xf32, #tpu.memory_space<vmem>>, %arg4: memref<512x256xbf16, #tpu.memory_space<vmem>>, %arg5: memref<1x256xf32, #tpu.memory_space<vmem>>, %arg6: memref<256x128xbf16, #tpu.memory_space<vmem>>, %arg7: memref<1x128xf32, #tpu.memory_space<vmem>>, %arg8: memref<128x128xbf16, #tpu.memory_space<vmem>>, %arg9: memref<1x128xf32, #tpu.memory_space<vmem>>, %arg10: memref<16x128xf32, #tpu.memory_space<vmem>>) attributes {dimension_semantics = [#tpu.dimension_semantics<parallel>], iteration_bounds = array<i64: 1>, scalar_prefetch = 0 : i64, scratch_operands = 0 : i64, tpu.core_type = #tpu.core_type<tc>, window_params = [{transform_indices = @transform_0, window_bounds = array<i64: 16, 32>}, {pipeline_mode = #tpu.pipeline_mode<synchronous>, transform_indices = @transform_1, window_bounds = array<i64: 32, 512>}, {pipeline_mode = #tpu.pipeline_mode<synchronous>, transform_indices = @transform_2, window_bounds = array<i64: 1, 512>}, {pipeline_mode = #tpu.pipeline_mode<synchronous>, transform_indices = @transform_3, window_bounds = array<i64: 512, 256>}, {pipeline_mode = #tpu.pipeline_mode<synchronous>, transform_indices = @transform_4, window_bounds = array<i64: 1, 256>}, {pipeline_mode = #tpu.pipeline_mode<synchronous>, transform_indices = @transform_5, window_bounds = array<i64: 256, 128>}, {pipeline_mode = #tpu.pipeline_mode<synchronous>, transform_indices = @transform_6, window_bounds = array<i64: 1, 128>}, {pipeline_mode = #tpu.pipeline_mode<synchronous>, transform_indices = @transform_7, window_bounds = array<i64: 128, 128>}, {pipeline_mode = #tpu.pipeline_mode<synchronous>, transform_indices = @transform_8, window_bounds = array<i64: 1, 128>}, {transform_indices = @transform_9, window_bounds = array<i64: 16, 128>}]} {
    %c0 = arith.constant 0 : index
    %c0_0 = arith.constant 0 : index
    %0 = vector.load %arg1[%c0, %c0_0] : memref<16x32xf32, #tpu.memory_space<vmem>>, vector<16x32xf32>
    %1 = arith.truncf %0 : vector<16x32xf32> to vector<16x32xbf16>
    %c0_1 = arith.constant 0 : index
    %c0_2 = arith.constant 0 : index
    %2 = vector.load %arg2[%c0_1, %c0_2] : memref<32x512xbf16, #tpu.memory_space<vmem>>, vector<32x512xbf16>
    %cst = arith.constant dense<0.000000e+00> : vector<16x512xf32>
    %3 = tpu.matmul %1, %2, %cst {dimension_numbers = #tpu.dot_dimension_numbers<[1], [0], [0], [1], [0, 0, 1, 1], [], []>} : vector<16x32xbf16>, vector<32x512xbf16>, vector<16x512xf32> -> vector<16x512xf32>
    %c0_3 = arith.constant 0 : index
    %c0_4 = arith.constant 0 : index
    %4 = vector.load %arg3[%c0_3, %c0_4] : memref<1x512xf32, #tpu.memory_space<vmem>>, vector<1x512xf32>
    %5 = vector.broadcast %4 : vector<1x512xf32> to vector<16x512xf32>
    %6 = arith.addf %3, %5 : vector<16x512xf32>
    %cst_5 = arith.constant 0.000000e+00 : f32
    %7 = vector.broadcast %cst_5 : f32 to vector<16x512xf32>
    %8 = arith.maximumf %6, %7 : vector<16x512xf32>
    %9 = arith.truncf %8 : vector<16x512xf32> to vector<16x512xbf16>
    %c0_6 = arith.constant 0 : index
    %c0_7 = arith.constant 0 : index
    %10 = vector.load %arg4[%c0_6, %c0_7] : memref<512x256xbf16, #tpu.memory_space<vmem>>, vector<512x256xbf16>
    %cst_8 = arith.constant dense<0.000000e+00> : vector<16x256xf32>
    %11 = tpu.matmul %9, %10, %cst_8 {dimension_numbers = #tpu.dot_dimension_numbers<[1], [0], [0], [1], [0, 0, 1, 1], [], []>} : vector<16x512xbf16>, vector<512x256xbf16>, vector<16x256xf32> -> vector<16x256xf32>
    %c0_9 = arith.constant 0 : index
    %c0_10 = arith.constant 0 : index
    %12 = vector.load %arg5[%c0_9, %c0_10] : memref<1x256xf32, #tpu.memory_space<vmem>>, vector<1x256xf32>
    %13 = vector.broadcast %12 : vector<1x256xf32> to vector<16x256xf32>
    %14 = arith.addf %11, %13 : vector<16x256xf32>
    %cst_11 = arith.constant 0.000000e+00 : f32
    %15 = vector.broadcast %cst_11 : f32 to vector<16x256xf32>
    %16 = arith.maximumf %14, %15 : vector<16x256xf32>
    %17 = arith.truncf %16 : vector<16x256xf32> to vector<16x256xbf16>
    %c0_12 = arith.constant 0 : index
    %c0_13 = arith.constant 0 : index
    %18 = vector.load %arg6[%c0_12, %c0_13] : memref<256x128xbf16, #tpu.memory_space<vmem>>, vector<256x128xbf16>
    %cst_14 = arith.constant dense<0.000000e+00> : vector<16x128xf32>
    %19 = tpu.matmul %17, %18, %cst_14 {dimension_numbers = #tpu.dot_dimension_numbers<[1], [0], [0], [1], [0, 0, 1, 1], [], []>} : vector<16x256xbf16>, vector<256x128xbf16>, vector<16x128xf32> -> vector<16x128xf32>
    %c0_15 = arith.constant 0 : index
    %c0_16 = arith.constant 0 : index
    %20 = vector.load %arg7[%c0_15, %c0_16] : memref<1x128xf32, #tpu.memory_space<vmem>>, vector<1x128xf32>
    %21 = vector.broadcast %20 : vector<1x128xf32> to vector<16x128xf32>
    %22 = arith.addf %19, %21 : vector<16x128xf32>
    %cst_17 = arith.constant 0.000000e+00 : f32
    %23 = vector.broadcast %cst_17 : f32 to vector<16x128xf32>
    %24 = arith.maximumf %22, %23 : vector<16x128xf32>
    %25 = arith.truncf %24 : vector<16x128xf32> to vector<16x128xbf16>
    %c0_18 = arith.constant 0 : index
    %c0_19 = arith.constant 0 : index
    %26 = vector.load %arg8[%c0_18, %c0_19] : memref<128x128xbf16, #tpu.memory_space<vmem>>, vector<128x128xbf16>
    %cst_20 = arith.constant dense<0.000000e+00> : vector<16x128xf32>
    %27 = tpu.matmul %25, %26, %cst_20 {dimension_numbers = #tpu.dot_dimension_numbers<[1], [0], [0], [1], [0, 0, 1, 1], [], []>} : vector<16x128xbf16>, vector<128x128xbf16>, vector<16x128xf32> -> vector<16x128xf32>
    %c0_21 = arith.constant 0 : index
    %c0_22 = arith.constant 0 : index
    %28 = vector.load %arg9[%c0_21, %c0_22] : memref<1x128xf32, #tpu.memory_space<vmem>>, vector<1x128xf32>
    %29 = vector.broadcast %28 : vector<1x128xf32> to vector<16x128xf32>
    %30 = arith.addf %27, %29 : vector<16x128xf32>
    %c0_23 = arith.constant 0 : index
    %c0_24 = arith.constant 0 : index
    %31 = vector.load %arg10[%c0_23, %c0_24] : memref<16x128xf32, #tpu.memory_space<vmem>>, vector<16x128xf32>
    tpu.vector_store %arg10[%c0_23, %c0_24], %30 {strides = array<i32>} : memref<16x128xf32, #tpu.memory_space<vmem>>, vector<16x128xf32>,
    return
  }
  func.func @transform_0(%arg0: i32) -> (i32, i32) {
    %c0_i32 = arith.constant 0 : i32
    %c0_i32_0 = arith.constant 0 : i32
    return %arg0, %c0_i32 : i32, i32
  }
  func.func @transform_1(%arg0: i32) -> (i32, i32) {
    %c0_i32 = arith.constant 0 : i32
    %c0_i32_0 = arith.constant 0 : i32
    %c0_i32_1 = arith.constant 0 : i32
    return %c0_i32, %c0_i32_0 : i32, i32
  }
  func.func @transform_2(%arg0: i32) -> (i32, i32) {
    %c0_i32 = arith.constant 0 : i32
    %c0_i32_0 = arith.constant 0 : i32
    %c0_i32_1 = arith.constant 0 : i32
    return %c0_i32, %c0_i32_0 : i32, i32
  }
  func.func @transform_3(%arg0: i32) -> (i32, i32) {
    %c0_i32 = arith.constant 0 : i32
    %c0_i32_0 = arith.constant 0 : i32
    %c0_i32_1 = arith.constant 0 : i32
    return %c0_i32, %c0_i32_0 : i32, i32
  }
  func.func @transform_4(%arg0: i32) -> (i32, i32) {
    %c0_i32 = arith.constant 0 : i32
    %c0_i32_0 = arith.constant 0 : i32
    %c0_i32_1 = arith.constant 0 : i32
    return %c0_i32, %c0_i32_0 : i32, i32
  }
  func.func @transform_5(%arg0: i32) -> (i32, i32) {
    %c0_i32 = arith.constant 0 : i32
    %c0_i32_0 = arith.constant 0 : i32
    %c0_i32_1 = arith.constant 0 : i32
    return %c0_i32, %c0_i32_0 : i32, i32
  }
  func.func @transform_6(%arg0: i32) -> (i32, i32) {
    %c0_i32 = arith.constant 0 : i32
    %c0_i32_0 = arith.constant 0 : i32
    %c0_i32_1 = arith.constant 0 : i32
    return %c0_i32, %c0_i32_0 : i32, i32
  }
  func.func @transform_7(%arg0: i32) -> (i32, i32) {
    %c0_i32 = arith.constant 0 : i32
    %c0_i32_0 = arith.constant 0 : i32
    %c0_i32_1 = arith.constant 0 : i32
    return %c0_i32, %c0_i32_0 : i32, i32
  }
  func.func @transform_8(%arg0: i32) -> (i32, i32) {
    %c0_i32 = arith.constant 0 : i32
    %c0_i32_0 = arith.constant 0 : i32
    %c0_i32_1 = arith.constant 0 : i32
    return %c0_i32, %c0_i32_0 : i32, i32
  }
  func.func @transform_9(%arg0: i32) -> (i32, i32) {
    %c0_i32 = arith.constant 0 : i32
    %c0_i32_0 = arith.constant 0 : i32
    return %arg0, %c0_i32 : i32, i32
  }
}

</mosaic_0001>

<bundles_post_ra>
// kernel: dqn_forward.1
= control target key start
LH: loop header
LB: loop body
LE: loop exit
PB: predicated region body
PF: predicated region fallthrough
CT: control target
= control target key end

     0   :  { %14 = vsyncpa [#allocation3], 0  ;;  %s1546_s0 = inlined_call_operand.vmem [shape: f32[16,32], index: 0, kind: input, shape index: {}]   ;;  %s1547_s1 = inlined_call_operand.hbm [shape: bf16[32,512], index: 1, kind: input, shape index: {}]   ;;  %s1548_s2 = inlined_call_operand.vmem [shape: f32[1,512], index: 2, kind: input, shape index: {}]   ;;  %s1549_s3 = inlined_call_operand.hbm [shape: bf16[512,256], index: 3, kind: input, shape index: {}]   ;;  %s1550_s4 = inlined_call_operand.vmem [shape: f32[1,256], index: 4, kind: input, shape index: {}]   ;;  %s1551_s5 = inlined_call_operand.hbm [shape: bf16[256,128], index: 5, kind: input, shape index: {}]   ;;  %s1552_s6 = inlined_call_operand.vmem [shape: f32[1,128], index: 6, kind: input, shape index: {}]   ;;  %s1553_s7 = inlined_call_operand.hbm [shape: bf16[128,128], index: 7, kind: input, shape index: {}]   ;;  %s1554_s8 = inlined_call_operand.vmem [shape: f32[1,128], index: 8, kind: input, shape index: {}]   ;;  %s1555_s9 = inlined_call_operand.vmem [shape: f32[16,128], index: 9, kind: output, shape index: {}]  }
   0x1   :  { %15 = vsyncpa [#allocation5], 0 }
   0x2   :  { %16 = vsyncpa [#allocation8], 0  ;;  %s1433_s30 = smov [#allocation4]  }
   0x3   :  { %s38_s10 = sshll.u32 %s1433_s30, 4  ;;  %s39_s10 = int_to_ptr.vmem [resolvable:$true] %s38_s10 }
   0x4   :  { %s1355_s11 = scalar_lea.vmem %s39_s10, 8192  ;;  %p1360_p1 = scmp.lt.s32.totalorder %s39_s10, %s39_s10 }
   0x5   :  { %p1356_p0 = scmp.ne.s32.totalorder %s39_s10, %s1355_s11  ;;  %p1361_p2 = scmp.lt.s32.totalorder %s1355_s11, %s1355_s11 }
   0x7   :  { %p1362_p3 = por %p1361_p2, %p1360_p1 }
   0x9   :  { %p1363_p4 = pnand %p1362_p3, %p1356_p0 }
   0xb   :  { %1366 = shalt.err (!%p1363_p4)
}
   0xc   :  { %s1434_s12 = smov 128   ;;  %s1435_s13 = smov 8  }
   0xd   :  { %44 = dma.hbm_to_vmem [thread:$0]  %s1549_s3, 8192, %s39_s10, [#allocation5], %s1434_s12, %s1434_s12, %s1435_s13  }
   0xe   :  { %s1436_s16 = smov [#allocation2]  }
   0xf   :  { %s24_s17 = sshll.u32 %s1436_s16, 4  ;;  %s25_s17 = int_to_ptr.vmem [resolvable:$true] %s24_s17 }
  0x10   :  { %s1375_s18 = scalar_lea.vmem %s25_s17, 1024  ;;  %p1380_p6 = scmp.lt.s32.totalorder %s25_s17, %s25_s17 }
  0x11   :  { %p1376_p5 = scmp.ne.s32.totalorder %s25_s17, %s1375_s18  ;;  %p1381_p7 = scmp.lt.s32.totalorder %s1375_s18, %s1375_s18 }
  0x13   :  { %p1382_p8 = por %p1381_p7, %p1380_p6 }
  0x15   :  { %p1383_p9 = pnand %p1382_p8, %p1376_p5 }
  0x17   :  { %1386 = shalt.err (!%p1383_p9)
}
  0x18   :  { %s1437_s19 = smov 256   ;;  %s1438_s20 = smov 16  }
  0x19   :  { %30 = dma.hbm_to_vmem [thread:$0]  %s1547_s1, 1024, %s25_s17, [#allocation3], %s1437_s19, %s1437_s19, %s1438_s20  }
  0x1a   :  { %s1439_s23 = smov [#allocation6]  }
  0x1b   :  { %s52_s24 = sshll.u32 %s1439_s23, 4  ;;  %s53_s24 = int_to_ptr.vmem [resolvable:$true] %s52_s24 }
  0x1c   :  { %s1395_s3 = scalar_lea.vmem %s53_s24, 2048  ;;  %p1400_p11 = scmp.lt.s32.totalorder %s53_s24, %s53_s24 }
  0x1d   :  { %p1396_p10 = scmp.ne.s32.totalorder %s53_s24, %s1395_s3  ;;  %p1401_p12 = scmp.lt.s32.totalorder %s1395_s3, %s1395_s3 }
  0x1f   :  { %p1402_p13 = por %p1401_p12, %p1400_p11 }
  0x21   :  { %p1403_p0 = pnand %p1402_p13, %p1396_p10 }
  0x23   :  { %1406 = shalt.err (!%p1403_p0)
}
  0x24   :  { %s1440_s25 = smov 64   ;;  %s1441_s26 = smov 4  }
  0x25   :  { %58 = dma.hbm_to_vmem [thread:$0]  %s1551_s5, 2048, %s53_s24, [#allocation5], %s1440_s25, %s1440_s25, %s1441_s26  }
  0x26   :  { %s1442_s29 = smov [#allocation7]  }
  0x27   :  { %s66_s30 = sshll.u32 %s1442_s29, 4  ;;  %s67_s30 = int_to_ptr.vmem [resolvable:$true] %s66_s30 }
  0x28   :  { %s1415_s1 = scalar_lea.vmem %s67_s30, 1024  ;;  %p1420_p2 = scmp.lt.s32.totalorder %s67_s30, %s67_s30 }
  0x29   :  { %p1416_p1 = scmp.ne.s32.totalorder %s67_s30, %s1415_s1  ;;  %p1421_p3 = scmp.lt.s32.totalorder %s1415_s1, %s1415_s1 }
  0x2b   :  { %p1422_p4 = por %p1421_p3, %p1420_p2 }
  0x2d   :  { %p1423_p5 = pnand %p1422_p4, %p1416_p1 }
  0x2f   :  { %1426 = shalt.err (!%p1423_p5)
}
  0x30   :  { %72 = dma.hbm_to_vmem [thread:$0]  %s1553_s7, 1024, %s67_s30, [#allocation8], %s1440_s25, %s1440_s25, %s1441_s26  }
  0x31   :  { %1427 = dma.done.wait [#allocation3], 1024  }
  0x32   :  { %1428 = vsyncadd [#allocation3], 4294966272 }
  0x33   :  { %1429 = dma.done.wait [#allocation5], 10240  }
  0x34   :  { %1430 = vsyncadd [#allocation5], 4294957056 }
  0x35   :  { %1431 = dma.done.wait [#allocation8], 1024  }
  0x36   :  { %1432 = vsyncadd [#allocation8], 4294966272  ;;  %v1443_v0 = vmov 0   ;;  %v1215_v1 = vld [vmem:[#allocation2 + $0x24] ss:$16 sps:$4 sm:$0xff]   ;;  %v89_v10 = vld [vmem:[%s1546_s0 + $0x8] sm:$0xff] }
  0x37   :  { %197 = vmatprep.mubr.bf16.mxu0 %v1443_v0  ;;  %240 = vmatprep.mubr.bf16.mxu1 %v1443_v0  ;;  %v1217_v2 = vld [vmem:[#allocation2 + $0x2c] ss:$16 sps:$4 sm:$0xff]   ;;  %v1219_v3 = vld [vmem:[#allocation2 + $0x20] ss:$16 sps:$4 sm:$0xff]   ;;  %v1220_v4 = vld [vmem:[#allocation2 + $0x28] ss:$16 sps:$4 sm:$0xff]  }
  0x38   :  { %177 = vmatprep.subr.bf16.mxu0 %v1215_v1  ;;  %220 = vmatprep.subr.bf16.mxu1 %v1217_v2  ;;  %v1221_v5 = vld [vmem:[#allocation2 + $0x4] ss:$16 sps:$4 sm:$0xff]   ;;  %v1223_v6 = vld [vmem:[#allocation2 + $0xc] ss:$16 sps:$4 sm:$0xff]   ;;  %v1225_v7 = vld [vmem:[#allocation2] ss:$16 sps:$4 sm:$0xff]  }
  0x39   :  { %178 = vmatpush1.bf16.msra.mxu0 %v1219_v3  ;;  %221 = vmatpush1.bf16.msra.mxu1 %v1220_v4  ;;  %v1226_v8 = vld [vmem:[#allocation2 + $0x8] ss:$16 sps:$4 sm:$0xff]   ;;  %v88_v9 = vld [vmem:[%s1546_s0] sm:$0xff]  ;;  %v1229_v13 = vld [vmem:[#allocation4 + $0x74] ss:$8 sps:$4 sm:$0xff]   ;;  %vm161_vm0 = vcmask 261120  }
  0x3a   :  { %179 = vmatprep.subr.bf16.mxu0 %v1221_v5  ;;  %222 = vmatprep.subr.bf16.mxu1 %v1223_v6  ;;  %v1227_v11 = vld [vmem:[#allocation4 + $0x70] ss:$8 sps:$4 sm:$0xff]   ;;  %v90_v12 = vpack.c.bf16 %v89_v10, %v88_v9  ;;  %v1232_v15 = vld [vmem:[#allocation4 + $0x174] ss:$8 sps:$4 sm:$0xff]   ;;  %v1235_v16 = vld [vmem:[#allocation4 + $0x64] ss:$8 sps:$4 sm:$0xff]  }
  0x3b   :  { %v1230_v14 = vld [vmem:[#allocation4 + $0x170] ss:$8 sps:$4 sm:$0xff]   ;;  %v1238_v17 = vld [vmem:[#allocation4 + $0x164] ss:$8 sps:$4 sm:$0xff]   ;;  %v1233_v18 = vld [vmem:[#allocation4 + $0x60] ss:$8 sps:$4 sm:$0xff]  }
  0x3c   :  { %v1236_v19 = vld [vmem:[#allocation4 + $0x160] ss:$8 sps:$4 sm:$0xff]   ;;  %v1241_v20 = vld [vmem:[#allocation4 + $0x54] ss:$8 sps:$4 sm:$0xff]   ;;  %v1239_v22 = vld [vmem:[#allocation4 + $0x50] ss:$8 sps:$4 sm:$0xff]  }
  0x3d   :  { %180 = vmatpush1.bf16.msra.mxu0 %v1225_v7  ;;  %223 = vmatpush1.bf16.msra.mxu1 %v1226_v8  ;;  %v1244_v21 = vld [vmem:[#allocation4 + $0x154] ss:$8 sps:$4 sm:$0xff]   ;;  %v1242_v23 = vld [vmem:[#allocation4 + $0x150] ss:$8 sps:$4 sm:$0xff]   ;;  %v1247_v24 = vld [vmem:[#allocation4 + $0x44] ss:$8 sps:$4 sm:$0xff]  }
  0x3e   :  { %659 = vmatprep.subr.bf16.mxu0 %v1229_v13  ;;  %702 = vmatprep.subr.bf16.mxu1 %v1232_v15  ;;  %v1250_v25 = vld [vmem:[#allocation4 + $0x144] ss:$8 sps:$4 sm:$0xff]   ;;  %v1245_v26 = vld [vmem:[#allocation4 + $0x40] ss:$8 sps:$4 sm:$0xff]   ;;  %v1253_v28 = vld [vmem:[#allocation4 + $0x34] ss:$8 sps:$4 sm:$0xff]   ;;  %v101_v13 = vlaneseq }
  0x3f   :  { %v1248_v27 = vld [vmem:[#allocation4 + $0x140] ss:$8 sps:$4 sm:$0xff]   ;;  %v1256_v29 = vld [vmem:[#allocation4 + $0x134] ss:$8 sps:$4 sm:$0xff]   ;;  %v1251_v30 = vld [vmem:[#allocation4 + $0x30] ss:$8 sps:$4 sm:$0xff]  }
  0x40   :  { %1059 = vmatmul.mubr.msk.bf16.vlgmr.msra.gmra.mxu0 %vm161_vm0, %v90_v12  ;;  %1060 = vmatmul.mubr.msk.bf16.vlgmr.msra.gmra.mxu1 %vm161_vm0, %v90_v12  ;;  %v1254_v31 = vld [vmem:[#allocation4 + $0x130] ss:$8 sps:$4 sm:$0xff]   ;;  %v1259_v32 = vld [vmem:[#allocation4 + $0x24] ss:$8 sps:$4 sm:$0xff]   ;;  %v1257_v34 = vld [vmem:[#allocation4 + $0x20] ss:$8 sps:$4 sm:$0xff]  }
  0x41   :  { %660 = vmatpush1.bf16.msra.mxu0 %v1227_v11  ;;  %703 = vmatpush1.bf16.msra.mxu1 %v1230_v14  ;;  %v1262_v33 = vld [vmem:[#allocation4 + $0x124] ss:$8 sps:$4 sm:$0xff]   ;;  %v1260_v35 = vld [vmem:[#allocation4 + $0x120] ss:$8 sps:$4 sm:$0xff]   ;;  %v1265_v36 = vld [vmem:[#allocation4 + $0x14] ss:$8 sps:$4 sm:$0xff]  }
  0x42   :  { %661 = vmatprep.subr.bf16.mxu0 %v1235_v16  ;;  %704 = vmatprep.subr.bf16.mxu1 %v1238_v17  ;;  %v1268_v37 = vld [vmem:[#allocation4 + $0x114] ss:$8 sps:$4 sm:$0xff]   ;;  %v1263_v38 = vld [vmem:[#allocation4 + $0x10] ss:$8 sps:$4 sm:$0xff]   ;;  %v1271_v40 = vld [vmem:[#allocation4 + $0x4] ss:$8 sps:$4 sm:$0xff]  }
  0x43   :  { %v1266_v39 = vld [vmem:[#allocation4 + $0x110] ss:$8 sps:$4 sm:$0xff]   ;;  %v1274_v41 = vld [vmem:[#allocation4 + $0x104] ss:$8 sps:$4 sm:$0xff]   ;;  %v1269_v42 = vld [vmem:[#allocation4] ss:$8 sps:$4 sm:$0xff]  }
  0x44   :  { %v1272_v43 = vld [vmem:[#allocation4 + $0x100] ss:$8 sps:$4 sm:$0xff]   ;;  %v1277_v44 = vld [vmem:[#allocation4 + $0xf4] ss:$8 sps:$4 sm:$0xff]   ;;  %v1275_v46 = vld [vmem:[#allocation4 + $0xf0] ss:$8 sps:$4 sm:$0xff]  }
  0x45   :  { %662 = vmatpush1.bf16.msra.mxu0 %v1233_v18  ;;  %705 = vmatpush1.bf16.msra.mxu1 %v1236_v19  ;;  %v1280_v45 = vld [vmem:[#allocation4 + $0x1f4] ss:$8 sps:$4 sm:$0xff]   ;;  %v1278_v47 = vld [vmem:[#allocation4 + $0x1f0] ss:$8 sps:$4 sm:$0xff]   ;;  %v1283_v48 = vld [vmem:[#allocation4 + $0xe4] ss:$8 sps:$4 sm:$0xff]  }
  0x46   :  { %663 = vmatprep.subr.bf16.mxu0 %v1241_v20  ;;  %706 = vmatprep.subr.bf16.mxu1 %v1244_v21  ;;  %v1286_v49 = vld [vmem:[#allocation4 + $0x1e4] ss:$8 sps:$4 sm:$0xff]   ;;  %v1281_v50 = vld [vmem:[#allocation4 + $0xe0] ss:$8 sps:$4 sm:$0xff]   ;;  %v1289_v52 = vld [vmem:[#allocation4 + $0xd4] ss:$8 sps:$4 sm:$0xff]  }
  0x47   :  { %v1284_v51 = vld [vmem:[#allocation4 + $0x1e0] ss:$8 sps:$4 sm:$0xff]   ;;  %v1292_v53 = vld [vmem:[#allocation4 + $0x1d4] ss:$8 sps:$4 sm:$0xff]   ;;  %v1287_v54 = vld [vmem:[#allocation4 + $0xd0] ss:$8 sps:$4 sm:$0xff]  }
  0x48   :  { %v1290_v55 = vld [vmem:[#allocation4 + $0x1d0] ss:$8 sps:$4 sm:$0xff]   ;;  %v1295_v56 = vld [vmem:[#allocation4 + $0xc4] ss:$8 sps:$4 sm:$0xff]   ;;  %v1293_v58 = vld [vmem:[#allocation4 + $0xc0] ss:$8 sps:$4 sm:$0xff]  }
  0x49   :  { %664 = vmatpush1.bf16.msra.mxu0 %v1239_v22  ;;  %707 = vmatpush1.bf16.msra.mxu1 %v1242_v23  ;;  %v1298_v57 = vld [vmem:[#allocation4 + $0x1c4] ss:$8 sps:$4 sm:$0xff]   ;;  %v1296_v59 = vld [vmem:[#allocation4 + $0x1c0] ss:$8 sps:$4 sm:$0xff]   ;;  %v1301_v60 = vld [vmem:[#allocation4 + $0xb4] ss:$8 sps:$4 sm:$0xff]  }
  0x4a   :  { %665 = vmatprep.subr.bf16.mxu0 %v1247_v24  ;;  %708 = vmatprep.subr.bf16.mxu1 %v1250_v25  ;;  %v1304_v61 = vld [vmem:[#allocation4 + $0x1b4] ss:$8 sps:$4 sm:$0xff]   ;;  %v1299_v62 = vld [vmem:[#allocation4 + $0xb0] ss:$8 sps:$4 sm:$0xff]   ;;  %v1307_v0 = vld [vmem:[#allocation4 + $0xa4] ss:$8 sps:$4 sm:$0xff]  }
  0x4b   :  { %v1302_v63 = vld [vmem:[#allocation4 + $0x1b0] ss:$8 sps:$4 sm:$0xff]   ;;  %v1310_v1 = vld [vmem:[#allocation4 + $0x1a4] ss:$8 sps:$4 sm:$0xff]   ;;  %v1305_v2 = vld [vmem:[#allocation4 + $0xa0] ss:$8 sps:$4 sm:$0xff]  }
  0x4c   :  { %v1308_v3 = vld [vmem:[#allocation4 + $0x1a0] ss:$8 sps:$4 sm:$0xff]   ;;  %v1313_v4 = vld [vmem:[#allocation4 + $0x94] ss:$8 sps:$4 sm:$0xff]   ;;  %v1311_v6 = vld [vmem:[#allocation4 + $0x90] ss:$8 sps:$4 sm:$0xff]  }
  0x4d   :  { %666 = vmatpush1.bf16.msra.mxu0 %v1245_v26  ;;  %709 = vmatpush1.bf16.msra.mxu1 %v1248_v27  ;;  %v1316_v5 = vld [vmem:[#allocation4 + $0x194] ss:$8 sps:$4 sm:$0xff]   ;;  %v1314_v7 = vld [vmem:[#allocation4 + $0x190] ss:$8 sps:$4 sm:$0xff]   ;;  %v1319_v8 = vld [vmem:[#allocation4 + $0x84] ss:$8 sps:$4 sm:$0xff]  }
  0x4e   :  { %667 = vmatprep.subr.bf16.mxu0 %v1253_v28  ;;  %710 = vmatprep.subr.bf16.mxu1 %v1256_v29  ;;  %v1322_v9 = vld [vmem:[#allocation4 + $0x184] ss:$8 sps:$4 sm:$0xff]   ;;  %v1317_v10 = vld [vmem:[#allocation4 + $0x80] ss:$8 sps:$4 sm:$0xff]   ;;  %v1323_v12 = vld [vmem:[#allocation6 + $0x78] sm:$0xff]   ;;  %v1514_v14 = vshrl.u32 %v101_v13, 7 }
  0x4f   :  { %v1320_v11 = vld [vmem:[#allocation4 + $0x180] ss:$8 sps:$4 sm:$0xff]   ;;  %vm1445_vm1 = vmmov 0  }
  0x50   :  { %v107_v15 = vsub.s32 1, %v1514_v14  ;;  %v115_v16 = vsub.s32 3, %v1514_v14  ;;  %v103_v17 = vsub.s32 0, %v1514_v14  ;;  %v111_v18 = vsub.s32 2, %v1514_v14  ;;  %v99_v19 = vld [vmem:[%s1548_s2] sm:$0xf] }
  0x51   :  { %668 = vmatpush1.bf16.msra.mxu0 %v1251_v30  ;;  %711 = vmatpush1.bf16.msra.mxu1 %v1254_v31 }
  0x52   :  { %669 = vmatprep.subr.bf16.mxu0 %v1259_v32  ;;  %712 = vmatprep.subr.bf16.mxu1 %v1262_v33  ;;  %v108_v22 = vrot.slane %v99_v19, %v107_v15  ;;  %v116_v23 = vrot.slane %v99_v19, %v115_v16  ;;  %v104_v24 = vrot.slane %v99_v19, %v103_v17 }
  0x53   :  { %v112_v25 = vrot.slane %v99_v19, %v111_v18 }
  0x55   :  { %670 = vmatpush1.bf16.msra.mxu0 %v1257_v34  ;;  %713 = vmatpush1.bf16.msra.mxu1 %v1260_v35 }
  0x56   :  { %671 = vmatprep.subr.bf16.mxu0 %v1265_v36  ;;  %714 = vmatprep.subr.bf16.mxu1 %v1268_v37 }
  0x59   :  { %672 = vmatpush1.bf16.msra.mxu0 %v1263_v38  ;;  %715 = vmatpush1.bf16.msra.mxu1 %v1266_v39 }
  0x5a   :  { %673 = vmatprep.subr.bf16.mxu0 %v1271_v40  ;;  %716 = vmatprep.subr.bf16.mxu1 %v1274_v41 }
  0x5d   :  { %674 = vmatpush1.bf16.msra.mxu0 %v1269_v42  ;;  %717 = vmatpush1.bf16.msra.mxu1 %v1272_v43 }
  0x5e   :  { %675 = vmatprep.subr.bf16.mxu0 %v1277_v44  ;;  %718 = vmatprep.subr.bf16.mxu1 %v1280_v45 }
  0x61   :  { %676 = vmatpush2.bf16.msra.mxu0 %v1275_v46  ;;  %719 = vmatpush2.bf16.msra.mxu1 %v1278_v47 }
  0x62   :  { %677 = vmatprep.subr.bf16.mxu0 %v1283_v48  ;;  %720 = vmatprep.subr.bf16.mxu1 %v1286_v49 }
  0x65   :  { %678 = vmatpush2.bf16.msra.mxu0 %v1281_v50  ;;  %721 = vmatpush2.bf16.msra.mxu1 %v1284_v51  ;;  %v1324_v50 = vld [vmem:[#allocation6 + $0x38] sm:$0xff]  }
  0x66   :  { %679 = vmatprep.subr.bf16.mxu0 %v1289_v52  ;;  %722 = vmatprep.subr.bf16.mxu1 %v1292_v53  ;;  %v1325_v53 = vld [vmem:[#allocation6 + $0x70] sm:$0xff]  }
  0x69   :  { %680 = vmatpush2.bf16.msra.mxu0 %v1287_v54  ;;  %723 = vmatpush2.bf16.msra.mxu1 %v1290_v55  ;;  %v1326_v54 = vld [vmem:[#allocation6 + $0x30] sm:$0xff]   ;;  %v1327_v55 = vld [vmem:[#allocation6 + $0x68] sm:$0xff]  }
  0x6a   :  { %681 = vmatprep.subr.bf16.mxu0 %v1295_v56  ;;  %724 = vmatprep.subr.bf16.mxu1 %v1298_v57  ;;  %v1328_v56 = vld [vmem:[#allocation6 + $0x28] sm:$0xff]   ;;  %v1329_v57 = vld [vmem:[#allocation6 + $0x60] sm:$0xff]  }
  0x6d   :  { %682 = vmatpush2.bf16.msra.mxu0 %v1293_v58  ;;  %725 = vmatpush2.bf16.msra.mxu1 %v1296_v59  ;;  %v1330_v58 = vld [vmem:[#allocation6 + $0x20] sm:$0xff]   ;;  %v1331_v59 = vld [vmem:[#allocation6 + $0x58] sm:$0xff]  }
  0x6e   :  { %683 = vmatprep.subr.bf16.mxu0 %v1301_v60  ;;  %726 = vmatprep.subr.bf16.mxu1 %v1304_v61  ;;  %v1332_v60 = vld [vmem:[#allocation6 + $0x18] sm:$0xff]   ;;  %v1333_v61 = vld [vmem:[#allocation6 + $0x50] sm:$0xff]  }
  0x71   :  { %684 = vmatpush2.bf16.msra.mxu0 %v1299_v62  ;;  %727 = vmatpush2.bf16.msra.mxu1 %v1302_v63  ;;  %v1334_v62 = vld [vmem:[#allocation6 + $0x10] sm:$0xff]   ;;  %v1335_v63 = vld [vmem:[#allocation6 + $0x48] sm:$0xff]  }
  0x72   :  { %685 = vmatprep.subr.bf16.mxu0 %v1307_v0  ;;  %728 = vmatprep.subr.bf16.mxu1 %v1310_v1  ;;  %v1336_v0 = vld [vmem:[#allocation6 + $0x8] sm:$0xff]   ;;  %v1337_v1 = vld [vmem:[#allocation6 + $0x40] sm:$0xff]  }
  0x75   :  { %686 = vmatpush2.bf16.msra.mxu0 %v1305_v2  ;;  %729 = vmatpush2.bf16.msra.mxu1 %v1308_v3  ;;  %v1338_v2 = vld [vmem:[#allocation6] sm:$0xff]   ;;  %v1339_v3 = vld [vmem:[#allocation7 + $0x38] sm:$0xff]  }
  0x76   :  { %687 = vmatprep.subr.bf16.mxu0 %v1313_v4  ;;  %730 = vmatprep.subr.bf16.mxu1 %v1316_v5  ;;  %v1444_v4 = vmov 0.0   ;;  %v1340_v5 = vld [vmem:[#allocation7 + $0x30] sm:$0xff]  }
  0x79   :  { %688 = vmatpush2.bf16.msra.mxu0 %v1311_v6  ;;  %731 = vmatpush2.bf16.msra.mxu1 %v1314_v7  ;;  %v1341_v6 = vld [vmem:[#allocation7 + $0x28] sm:$0xff]   ;;  %v1342_v7 = vld [vmem:[#allocation7 + $0x20] sm:$0xff]  }
  0x7a   :  { %689 = vmatprep.subr.bf16.mxu0 %v1319_v8  ;;  %732 = vmatprep.subr.bf16.mxu1 %v1322_v9  ;;  %v327_v8 = vld [vmem:[%s1550_s4] sm:$0x3] }
  0x7b   :  { %v336_v9 = vrot.slane %v327_v8, %v107_v15 }
  0x7d   :  { %690 = vmatpush2.bf16.msra.mxu0 %v1317_v10  ;;  %733 = vmatpush2.bf16.msra.mxu1 %v1320_v11  ;;  %v332_v10 = vrot.slane %v327_v8, %v103_v17 }
  0x7e   :  { %1151 = vmatprep.subr.bf16.mxu0 %v1323_v12  ;;  %1182 = vmatprep.subr.bf16.mxu1 %v1444_v4 }
 0x100   :  { %v199_v20 = vpop.f32.mrf.mxu0  ;;  %v242_v21 = vpop.f32.mrf.mxu1 }
 0x101   :  { %v200_v34 = vadd.f32 %v199_v20, %v104_v24  ;;  %v243_v35 = vadd.f32 %v242_v21, %v112_v25 }
 0x102   :  { %v201_v26 = vpop.f32.mrf.mxu0  ;;  %v244_v27 = vpop.f32.mrf.mxu1 }
 0x103   :  { %v202_v30 = vadd.f32 %v201_v26, %v108_v22  ;;  %v245_v31 = vadd.f32 %v244_v27, %v116_v23  ;;  %v251_v46 = vmax.f32 %v200_v34, 0.0  ;;  %v253_v47 = vmax.f32 %v243_v35, 0.0  ;;  %v1344_v34 = vld [vmem:[#allocation7 + $0x10] sm:$0xff]   ;;  %v1345_v35 = vld [vmem:[#allocation7 + $0x8] sm:$0xff]  }
 0x104   :  { %v203_v28 = vpop.f32.mrf.mxu0  ;;  %v246_v29 = vpop.f32.mrf.mxu1 }
 0x105   :  { %v204_v32 = vadd.f32 %v203_v28, %v104_v24  ;;  %v247_v33 = vadd.f32 %v246_v29, %v112_v25  ;;  %v252_v42 = vmax.f32 %v202_v30, 0.0  ;;  %v254_v43 = vmax.f32 %v245_v31, 0.0 }
 0x106   :  { %v205_v36 = vpop.f32.mrf.mxu0  ;;  %v248_v37 = vpop.f32.mrf.mxu1 }
 0x107   :  { %v206_v38 = vadd.f32 %v205_v36, %v108_v22  ;;  %v249_v39 = vadd.f32 %v248_v37, %v116_v23  ;;  %v255_v40 = vmax.f32 %v204_v32, 0.0  ;;  %v257_v41 = vmax.f32 %v247_v33, 0.0  ;;  %v1343_v33 = vld [vmem:[#allocation7 + $0x18] sm:$0xff]   ;;  %v1346_v36 = vld [vmem:[#allocation7] sm:$0xff]  }
 0x109   :  { %v256_v44 = vmax.f32 %v206_v38, 0.0  ;;  %v258_v45 = vmax.f32 %v249_v39, 0.0  ;;  %v259_v51 = vpack.c.bf16 %v255_v40, %v251_v46  ;;  %v261_v52 = vpack.c.bf16 %v257_v41, %v253_v47  ;;  %v1125_v40 = vld [vmem:[%s1552_s6] ss:$0 sm:$0xff] }
 0x10b   :  { %v260_v48 = vpack.c.bf16 %v256_v44, %v252_v42  ;;  %v262_v49 = vpack.c.bf16 %v258_v45, %v254_v43 }
 0x10d   :  { %691 = vmatprep.mubr.bf16.mxu0 %v260_v48  ;;  %734 = vmatprep.mubr.bf16.mxu1 %v262_v49  ;;  %v1142_v49 = vld [vmem:[%s1554_s8] ss:$0 sm:$0xff] }
 0x10e   :  { %692 = vmatmul.mubr.bf16.vlgmr.msra.gmra.mxu0 %v259_v51  ;;  %735 = vmatmul.mubr.bf16.vlgmr.msra.gmra.mxu1 %v261_v52 }
 0x10f   :  { %1152 = vmatpush3.bf16.msra.mxu0 %v1324_v50  ;;  %1183 = vmatpush3.bf16.msra.mxu1 %v1339_v3 }
 0x110   :  { %1153 = vmatprep.subr.bf16.mxu0 %v1325_v53  ;;  %1184 = vmatprep.subr.bf16.mxu1 %v1444_v4 }
 0x111   :  { %1198 = vmatprep.mubr.msk.bf16.mxu1 %vm1445_vm1, %v1444_v4 }
 0x113   :  { %1154 = vmatpush3.bf16.msra.mxu0 %v1326_v54  ;;  %1185 = vmatpush3.bf16.msra.mxu1 %v1340_v5 }
 0x114   :  { %1155 = vmatprep.subr.bf16.mxu0 %v1327_v55  ;;  %1186 = vmatprep.subr.bf16.mxu1 %v1444_v4 }
 0x117   :  { %1156 = vmatpush3.bf16.msra.mxu0 %v1328_v56  ;;  %1187 = vmatpush3.bf16.msra.mxu1 %v1341_v6 }
 0x118   :  { %1157 = vmatprep.subr.bf16.mxu0 %v1329_v57  ;;  %1188 = vmatprep.subr.bf16.mxu1 %v1444_v4 }
 0x11b   :  { %1158 = vmatpush3.bf16.msra.mxu0 %v1330_v58  ;;  %1189 = vmatpush3.bf16.msra.mxu1 %v1342_v7 }
 0x11c   :  { %1159 = vmatprep.subr.bf16.mxu0 %v1331_v59  ;;  %1190 = vmatprep.subr.bf16.mxu1 %v1444_v4 }
 0x11f   :  { %1160 = vmatpush3.bf16.msra.mxu0 %v1332_v60  ;;  %1191 = vmatpush3.bf16.msra.mxu1 %v1343_v33 }
 0x120   :  { %1161 = vmatprep.subr.bf16.mxu0 %v1333_v61  ;;  %1192 = vmatprep.subr.bf16.mxu1 %v1444_v4 }
 0x123   :  { %1162 = vmatpush3.bf16.msra.mxu0 %v1334_v62  ;;  %1193 = vmatpush3.bf16.msra.mxu1 %v1344_v34 }
 0x124   :  { %1163 = vmatprep.subr.bf16.mxu0 %v1335_v63  ;;  %1194 = vmatprep.subr.bf16.mxu1 %v1444_v4 }
 0x127   :  { %1164 = vmatpush3.bf16.msra.mxu0 %v1336_v0  ;;  %1195 = vmatpush3.bf16.msra.mxu1 %v1345_v35 }
 0x128   :  { %1165 = vmatprep.subr.bf16.mxu0 %v1337_v1  ;;  %1196 = vmatprep.subr.bf16.mxu1 %v1444_v4 }
 0x12b   :  { %1166 = vmatpush3.bf16.msra.mxu0 %v1338_v2  ;;  %1197 = vmatpush3.bf16.msra.mxu1 %v1346_v36 }
 0x1ce   :  { %v693_v11 = vpop.f32.mrf.mxu0  ;;  %v736_v12 = vpop.f32.mrf.mxu1 }
 0x1cf   :  { %v694_v19 = vadd.f32 %v693_v11, %v332_v10 }
 0x1d0   :  { %v695_v13 = vpop.f32.mrf.mxu0  ;;  %v738_v16 = vpop.f32.mrf.mxu1 }
 0x1d1   :  { %v696_v18 = vadd.f32 %v695_v13, %v336_v9  ;;  %v737_v27 = vadd.f32 %v736_v12, %v694_v19 }
 0x1d2   :  { %v697_v20 = vpop.f32.mrf.mxu0  ;;  %v740_v21 = vpop.f32.mrf.mxu1 }
 0x1d3   :  { %v698_v22 = vadd.f32 %v697_v20, %v332_v10  ;;  %v739_v24 = vadd.f32 %v738_v16, %v696_v18  ;;  %v745_v17 = vmax.f32 %v737_v27, 0.0 }
 0x1d4   :  { %v699_v23 = vpop.f32.mrf.mxu0  ;;  %v742_v28 = vpop.f32.mrf.mxu1 }
 0x1d5   :  { %v741_v25 = vadd.f32 %v740_v21, %v698_v22  ;;  %v700_v26 = vadd.f32 %v699_v23, %v336_v9  ;;  %v746_v30 = vmax.f32 %v739_v24, 0.0 }
 0x1d7   :  { %v743_v29 = vadd.f32 %v742_v28, %v700_v26  ;;  %v747_v15 = vmax.f32 %v741_v25, 0.0 }
 0x1d9   :  { %v748_v14 = vmax.f32 %v743_v29, 0.0  ;;  %v749_v32 = vpack.c.bf16 %v747_v15, %v745_v17 }
 0x1db   :  { %v750_v31 = vpack.c.bf16 %v748_v14, %v746_v30 }
 0x1dd   :  { %918 = vmatprep.mubr.bf16.mxu0 %v750_v31 }
 0x1de   :  { %919 = vmatmul.mubr.bf16.vlgmr.msra.gmra.mxu0 %v749_v32 }
 0x29e   :  { %v1167_v37 = vpop.f32.mrf.mxu0 }
 0x2a0   :  { %v1168_v38 = vpop.f32.mrf.mxu0 }
 0x2a1   :  { %v1169_v39 = vadd.f32 %v1168_v38, %v1167_v37 }
 0x2a2   :  { %v1170_v41 = vpop.f32.mrf.mxu0 }
 0x2a3   :  { %v921_v43 = vadd.f32 %v1169_v39, %v1125_v40 }
 0x2a4   :  { %v1171_v42 = vpop.f32.mrf.mxu0 }
 0x2a5   :  { %v1172_v44 = vadd.f32 %v1171_v42, %v1170_v41  ;;  %v927_v46 = vmax.f32 %v921_v43, 0.0 }
 0x2a7   :  { %v924_v45 = vadd.f32 %v1172_v44, %v1125_v40 }
 0x2a9   :  { %v928_v47 = vmax.f32 %v924_v45, 0.0 }
 0x2ab   :  { %v929_v48 = vpack.c.bf16 %v928_v47, %v927_v46 }
 0x2ad   :  { %1199 = vmatmul.mubr.bf16.vlgmr.msra.gmra.mxu1 %v929_v48 }
 0x36d   :  { %v1035_v50 = vpop.f32.mrf.mxu1 }
 0x36e   :  { %v1036_v51 = vadd.f32 %v1142_v49, %v1035_v50 }
 0x36f   :  { %v1200_v52 = vpop.f32.mrf.mxu1 }
 0x370   :  { %1042 = vst [vmem:[%s1555_s9] sm:$0xff] %v1036_v51 }
 0x371   :  { %v1038_v53 = vpop.f32.mrf.mxu1 }
 0x372   :  { %v1039_v54 = vadd.f32 %v1142_v49, %v1038_v53 }
 0x373   :  { %v1201_v55 = vpop.f32.mrf.mxu1 }
 0x374   :  { %1043 = vst [vmem:[%s1555_s9 + $0x8] sm:$0xff] %v1039_v54 }
 0x375   :  { %1048 = vsyncpa [#allocation3], 1 }
 0x376   :  { %1049 = vsyncpa [#allocation5], 1 }
 0x377   :  { %1050 = vsyncpa [#allocation8], 1 }

</bundles_post_ra>
